<compile_context>
chip_gen: v7x
topology: tpu7x:2x2x1
jax: 0.10.0
libtpu: 0.0.40
codegen_flags: <defaults>
</compile_context>

<pallas_src>
import jax
import jax.numpy as jnp
from jax.experimental import pallas as pl
from jax.experimental.pallas import tpu as pltpu


def maxattn_kernel(x_ref, wqt_ref, wkt_ref, wvt_ref, wot_ref, hseg_ref,
                   bin_ref, bout_ref, out_ref, w_ref):
    x = x_ref[...]                                   # (Bblk, T, E) float32
    Bb, T, E = x.shape

    # Max-pooled query over the sequence dim: one sublane reduce per block.
    query = jnp.max(x, axis=1)                       # (Bblk, E)

    # Input projections as batched-M MXU matmuls (weights pre-transposed).
    x2 = x.reshape(Bb * T, E)                        # (Bblk*T, E)
    q = jnp.dot(query, wqt_ref[...],
                preferred_element_type=jnp.float32) + bin_ref[0:1, :]
    k = jnp.dot(x2, wkt_ref[...],
                preferred_element_type=jnp.float32) + bin_ref[1:2, :]
    v = jnp.dot(x2, wvt_ref[...],
                preferred_element_type=jnp.float32) + bin_ref[2:3, :]
    k = k.reshape(Bb, T, E)
    v = v.reshape(Bb, T, E)

    # Per-head scores, replicated across each head's d lanes so the lane dim
    # stays E end-to-end.  hseg is (E, E) block-diagonal ones * 1/sqrt(d).
    qk = q[:, None, :] * k                           # (Bblk, T, E)
    s = jnp.dot(qk.reshape(Bb * T, E), hseg_ref[...],
                preferred_element_type=jnp.float32).reshape(Bb, T, E)

    # Softmax over the key dim (T), per lane (== per head, replicated).
    s = s - jnp.max(s, axis=1, keepdims=True)
    e = jnp.exp(s)
    p = e / jnp.sum(e, axis=1, keepdims=True)        # (Bblk, T, E)

    ctx = jnp.sum(p * v, axis=1)                     # (Bblk, E)
    out = jnp.dot(ctx, wot_ref[...],
                  preferred_element_type=jnp.float32) + bout_ref[...]

    # Lanes within a head carry identical weights, so lane-mean == head-mean.
    avg_w = jnp.sum(p, axis=-1) * (1.0 / E)          # (Bblk, T)

    # Unique results only; T-fold replication happens in the wrapper.
    out_ref[0] = out
    w_ref[0] = avg_w


def _choose_block_b(B, T, E, target_rows=512, vmem_budget_bytes=12 << 20):
    """Batch rows per grid step: large enough for MXU-sized (Bblk*T, E) matmuls,
    small enough for default scoped VMEM on v5e/v6e/v7x, and leaving >= 2 grid
    steps so v7x's two TensorCores both get work."""
    bb = max(1, min(B, -(-target_rows // T)))
    if B >= 2:
        bb = min(bb, -(-B // 2))                     # keep >= 2 grid steps

    def step_bytes(b):
        x_b = b * T * E * 4 * 2                      # input block, double-buffered
        o_b = (b * E + b * T) * 4 * 2                # output blocks, double-buffered
        w_b = (5 * E * E + 4 * E) * 4 * 2            # grid-invariant weights/biases
        i_b = 4 * b * T * E * 4                      # k/v/qk/p live intermediates
        return x_b + o_b + w_b + i_b

    while bb > 1 and step_bytes(bb) > vmem_budget_bytes:
        bb //= 2
    return max(1, bb)


def maxattn_forward(hidden, params, num_heads, block_b=None):
    """hidden: (T, B, E) float32.  Returns ((T, B, E), (B, T, T))."""
    T, B, E = hidden.shape
    assert E % num_heads == 0
    d = E // num_heads
    if block_b is None:
        block_b = _choose_block_b(B, T, E)
    grid_b = pl.cdiv(B, block_b)
    B_pad = grid_b * block_b

    x = jnp.transpose(hidden, (1, 0, 2))             # (B, T, E)
    if B_pad != B:
        x = jnp.pad(x, ((0, B_pad - B), (0, 0), (0, 0)))

    in_w = params["in_proj_weight"]                  # (3E, E)
    in_b = params["in_proj_bias"]                    # (3E,)
    out_w = params["out_proj_weight"]                # (E, E)
    out_b = params["out_proj_bias"]                  # (E,)

    wqt = in_w[0:E].T                                # (E, E), so x @ wqt == x @ Wq^T
    wkt = in_w[E:2 * E].T
    wvt = in_w[2 * E:3 * E].T
    wot = out_w.T
    bin2d = in_b.reshape(3, E)                       # rows: [bq, bk, bv]
    bout2d = out_b.reshape(1, E)

    # Scaled block-diagonal ones matrix: head-local score sums on the MXU.
    head_id = jnp.arange(E, dtype=jnp.int32) // d
    hseg = (head_id[:, None] == head_id[None, :]).astype(jnp.float32)
    hseg = hseg * jnp.float32(1.0 / float(d) ** 0.5)

    out_blk, w_blk = pl.pallas_call(
        maxattn_kernel,
        out_shape=(jax.ShapeDtypeStruct((grid_b, block_b, E), jnp.float32),
                   jax.ShapeDtypeStruct((grid_b, block_b, T), jnp.float32)),
        grid_spec=pl.GridSpec(
            grid=(grid_b,),
            in_specs=[
                pl.BlockSpec((block_b, T, E), lambda b: (b, 0, 0)),   # hidden block
                pl.BlockSpec((E, E), lambda b: (0, 0)),               # Wq^T
                pl.BlockSpec((E, E), lambda b: (0, 0)),               # Wk^T
                pl.BlockSpec((E, E), lambda b: (0, 0)),               # Wv^T
                pl.BlockSpec((E, E), lambda b: (0, 0)),               # Wo^T
                pl.BlockSpec((E, E), lambda b: (0, 0)),               # head-seg mask
                pl.BlockSpec((3, E), lambda b: (0, 0)),               # in_proj bias
                pl.BlockSpec((1, E), lambda b: (0, 0)),               # out_proj bias
            ],
            out_specs=[
                pl.BlockSpec((1, block_b, E), lambda b: (b, 0, 0)),   # unique out
                pl.BlockSpec((1, block_b, T), lambda b: (b, 0, 0)),   # unique weights
            ],
        ),
        compiler_params=pltpu.CompilerParams(
            dimension_semantics=("parallel",)),
    )(x, wqt, wkt, wvt, wot, hseg, bin2d, bout2d)

    out_be = out_blk.reshape(B_pad, E)[:B]           # unique (B, E)
    w_bt = w_blk.reshape(B_pad, T)[:B]               # unique (B, T)

    # torch.cat([out]*T, dim=0) / torch.cat([weight]*T, dim=1) == broadcast.
    out_tbe = jnp.broadcast_to(out_be[None, :, :], (T, B, E))
    w_btt = jnp.broadcast_to(w_bt[:, None, :], (B, T, T))
    return out_tbe, w_btt


def maxattn_reference(hidden, params, num_heads):
    """Pure-JAX reference mirroring torch.nn.MultiheadAttention semantics."""
    T, B, E = hidden.shape
    d = E // num_heads
    in_w, in_b = params["in_proj_weight"], params["in_proj_bias"]
    out_w, out_b = params["out_proj_weight"], params["out_proj_bias"]

    query = jnp.max(hidden, axis=0, keepdims=True)              # (1, B, E)
    q = query @ in_w[0:E].T + in_b[0:E]
    k = hidden @ in_w[E:2 * E].T + in_b[E:2 * E]
    v = hidden @ in_w[2 * E:].T + in_b[2 * E:]

    def split(t):                                               # (L,B,E)->(B,H,L,d)
        return jnp.transpose(t.reshape(t.shape[0], B, num_heads, d), (1, 2, 0, 3))

    qh, kh, vh = split(q), split(k), split(v)
    s = jnp.einsum('bhqd,bhkd->bhqk', qh * (d ** -0.5), kh)     # (B, H, 1, T)
    p = jax.nn.softmax(s, axis=-1)
    o = jnp.einsum('bhqk,bhkd->bhqd', p, vh)                    # (B, H, 1, d)
    o = jnp.transpose(o, (2, 0, 1, 3)).reshape(1, B, E)         # (1, B, E)
    o = o @ out_w.T + out_b
    w = jnp.mean(p, axis=1)                                     # (B, 1, T)
    return (jnp.broadcast_to(o, (T, B, E)),
            jnp.broadcast_to(w, (B, T, T)))


def init_params(key, embed_dim):
    k1, k2, k3 = jax.random.split(key, 3)
    s = 1.0 / (embed_dim ** 0.5)
    return {
        "in_proj_weight": jax.random.uniform(k1, (3 * embed_dim, embed_dim),
                                             jnp.float32, -s, s),
        "in_proj_bias": jnp.zeros((3 * embed_dim,), jnp.float32),
        "out_proj_weight": jax.random.uniform(k2, (embed_dim, embed_dim),
                                              jnp.float32, -s, s),
        "out_proj_bias": jax.random.uniform(k3, (embed_dim,),
                                            jnp.float32, -s, s),
    }


if __name__ == "__main__":
    T, B, E, H = 8, 2, 32, 4

    key = jax.random.PRNGKey(0)
    k_x, k_p = jax.random.split(key)
    hidden = jax.random.normal(k_x, (T, B, E), jnp.float32)
    params = init_params(k_p, E)

    out, weight = maxattn_forward(hidden, params, H)
    out, weight = jax.block_until_ready((out, weight))

    ref_out, ref_w = maxattn_reference(hidden, params, H)
    assert out.shape == (T, B, E) and weight.shape == (B, T, T)
    assert jnp.allclose(out, ref_out, atol=2e-3, rtol=2e-3)
    assert jnp.allclose(weight, ref_w, atol=2e-3, rtol=2e-3)

    print("KERNEL_OK")
</pallas_src>

<mosaic_0001>
module attributes {stable_mosaic.version = 11 : i64} {
  func.func @maxattn_kernel(%arg0: i32, %arg1: memref<1x8x32xf32, #tpu.memory_space<vmem>>, %arg2: memref<32x32xf32, #tpu.memory_space<vmem>>, %arg3: memref<32x32xf32, #tpu.memory_space<vmem>>, %arg4: memref<32x32xf32, #tpu.memory_space<vmem>>, %arg5: memref<32x32xf32, #tpu.memory_space<vmem>>, %arg6: memref<32x32xf32, #tpu.memory_space<vmem>>, %arg7: memref<3x32xf32, #tpu.memory_space<vmem>>, %arg8: memref<1x32xf32, #tpu.memory_space<vmem>>, %arg9: memref<1x1x32xf32, #tpu.memory_space<vmem>>, %arg10: memref<1x1x8xf32, #tpu.memory_space<vmem>>) attributes {dimension_semantics = [#tpu.dimension_semantics<parallel>], iteration_bounds = array<i64: 2>, scalar_prefetch = 0 : i64, scratch_operands = 0 : i64, tpu.core_type = #tpu.core_type<tc>, window_params = [{transform_indices = @transform_0, window_bounds = array<i64: 1, 8, 32>}, {pipeline_mode = #tpu.pipeline_mode<synchronous>, transform_indices = @transform_1, window_bounds = array<i64: 32, 32>}, {pipeline_mode = #tpu.pipeline_mode<synchronous>, transform_indices = @transform_2, window_bounds = array<i64: 32, 32>}, {pipeline_mode = #tpu.pipeline_mode<synchronous>, transform_indices = @transform_3, window_bounds = array<i64: 32, 32>}, {pipeline_mode = #tpu.pipeline_mode<synchronous>, transform_indices = @transform_4, window_bounds = array<i64: 32, 32>}, {pipeline_mode = #tpu.pipeline_mode<synchronous>, transform_indices = @transform_5, window_bounds = array<i64: 32, 32>}, {pipeline_mode = #tpu.pipeline_mode<synchronous>, transform_indices = @transform_6, window_bounds = array<i64: 3, 32>}, {pipeline_mode = #tpu.pipeline_mode<synchronous>, transform_indices = @transform_7, window_bounds = array<i64: 1, 32>}, {transform_indices = @transform_8, window_bounds = array<i64: 1, 1, 32>}, {transform_indices = @transform_9, window_bounds = array<i64: 1, 1, 8>}]} {
    %c0 = arith.constant 0 : index
    %c0_0 = arith.constant 0 : index
    %c0_1 = arith.constant 0 : index
    %0 = vector.load %arg1[%c0, %c0_0, %c0_1] : memref<1x8x32xf32, #tpu.memory_space<vmem>>, vector<1x8x32xf32>
    %cst = arith.constant dense<0xFF800000> : vector<1x32xf32>
    %1 = vector.multi_reduction <maximumf>, %0, %cst [1] : vector<1x8x32xf32> to vector<1x32xf32>
    %2 = vector.shape_cast %0 : vector<1x8x32xf32> to vector<8x32xf32>
    %c0_2 = arith.constant 0 : index
    %c0_3 = arith.constant 0 : index
    %3 = vector.load %arg2[%c0_2, %c0_3] : memref<32x32xf32, #tpu.memory_space<vmem>>, vector<32x32xf32>
    %cst_4 = arith.constant dense<0.000000e+00> : vector<1x32xf32>
    %4 = tpu.matmul %1, %3, %cst_4 {dimension_numbers = #tpu.dot_dimension_numbers<[1], [0], [0], [1], [0, 0, 1, 1], [], []>} : vector<1x32xf32>, vector<32x32xf32>, vector<1x32xf32> -> vector<1x32xf32>
    %c0_5 = arith.constant 0 : index
    %c0_6 = arith.constant 0 : index
    %5 = vector.load %arg7[%c0_5, %c0_6] : memref<3x32xf32, #tpu.memory_space<vmem>>, vector<1x32xf32>
    %6 = arith.addf %4, %5 : vector<1x32xf32>
    %c0_7 = arith.constant 0 : index
    %c0_8 = arith.constant 0 : index
    %7 = vector.load %arg3[%c0_7, %c0_8] : memref<32x32xf32, #tpu.memory_space<vmem>>, vector<32x32xf32>
    %cst_9 = arith.constant dense<0.000000e+00> : vector<8x32xf32>
    %8 = tpu.matmul %2, %7, %cst_9 {dimension_numbers = #tpu.dot_dimension_numbers<[1], [0], [0], [1], [0, 0, 1, 1], [], []>} : vector<8x32xf32>, vector<32x32xf32>, vector<8x32xf32> -> vector<8x32xf32>
    %c1 = arith.constant 1 : index
    %c0_10 = arith.constant 0 : index
    %9 = vector.load %arg7[%c1, %c0_10] : memref<3x32xf32, #tpu.memory_space<vmem>>, vector<1x32xf32>
    %10 = vector.broadcast %9 : vector<1x32xf32> to vector<8x32xf32>
    %11 = arith.addf %8, %10 : vector<8x32xf32>
    %c0_11 = arith.constant 0 : index
    %c0_12 = arith.constant 0 : index
    %12 = vector.load %arg4[%c0_11, %c0_12] : memref<32x32xf32, #tpu.memory_space<vmem>>, vector<32x32xf32>
    %cst_13 = arith.constant dense<0.000000e+00> : vector<8x32xf32>
    %13 = tpu.matmul %2, %12, %cst_13 {dimension_numbers = #tpu.dot_dimension_numbers<[1], [0], [0], [1], [0, 0, 1, 1], [], []>} : vector<8x32xf32>, vector<32x32xf32>, vector<8x32xf32> -> vector<8x32xf32>
    %c2 = arith.constant 2 : index
    %c0_14 = arith.constant 0 : index
    %14 = vector.load %arg7[%c2, %c0_14] : memref<3x32xf32, #tpu.memory_space<vmem>>, vector<1x32xf32>
    %15 = vector.broadcast %14 : vector<1x32xf32> to vector<8x32xf32>
    %16 = arith.addf %13, %15 : vector<8x32xf32>
    %17 = vector.shape_cast %11 : vector<8x32xf32> to vector<1x8x32xf32>
    %18 = vector.shape_cast %16 : vector<8x32xf32> to vector<1x8x32xf32>
    %19 = vector.shape_cast %6 : vector<1x32xf32> to vector<1x1x32xf32>
    %20 = vector.broadcast %19 : vector<1x1x32xf32> to vector<1x8x32xf32>
    %21 = arith.mulf %20, %17 : vector<1x8x32xf32>
    %22 = vector.shape_cast %21 : vector<1x8x32xf32> to vector<8x32xf32>
    %c0_15 = arith.constant 0 : index
    %c0_16 = arith.constant 0 : index
    %23 = vector.load %arg6[%c0_15, %c0_16] : memref<32x32xf32, #tpu.memory_space<vmem>>, vector<32x32xf32>
    %cst_17 = arith.constant dense<0.000000e+00> : vector<8x32xf32>
    %24 = tpu.matmul %22, %23, %cst_17 {dimension_numbers = #tpu.dot_dimension_numbers<[1], [0], [0], [1], [0, 0, 1, 1], [], []>} : vector<8x32xf32>, vector<32x32xf32>, vector<8x32xf32> -> vector<8x32xf32>
    %25 = vector.shape_cast %24 : vector<8x32xf32> to vector<1x8x32xf32>
    %cst_18 = arith.constant dense<0xFF800000> : vector<1x32xf32>
    %26 = vector.multi_reduction <maximumf>, %25, %cst_18 [1] : vector<1x8x32xf32> to vector<1x32xf32>
    %27 = vector.shape_cast %26 : vector<1x32xf32> to vector<1x1x32xf32>
    %28 = vector.broadcast %27 : vector<1x1x32xf32> to vector<1x8x32xf32>
    %29 = arith.subf %25, %28 : vector<1x8x32xf32>
    %30 = math.exp %29 : vector<1x8x32xf32>
    %cst_19 = arith.constant dense<0.000000e+00> : vector<1x32xf32>
    %31 = vector.multi_reduction <add>, %30, %cst_19 [1] : vector<1x8x32xf32> to vector<1x32xf32>
    %32 = vector.shape_cast %31 : vector<1x32xf32> to vector<1x1x32xf32>
    %33 = vector.broadcast %32 : vector<1x1x32xf32> to vector<1x8x32xf32>
    %34 = arith.divf %30, %33 : vector<1x8x32xf32>
    %35 = arith.mulf %34, %18 : vector<1x8x32xf32>
    %cst_20 = arith.constant dense<0.000000e+00> : vector<1x32xf32>
    %36 = vector.multi_reduction <add>, %35, %cst_20 [1] : vector<1x8x32xf32> to vector<1x32xf32>
    %c0_21 = arith.constant 0 : index
    %c0_22 = arith.constant 0 : index
    %37 = vector.load %arg5[%c0_21, %c0_22] : memref<32x32xf32, #tpu.memory_space<vmem>>, vector<32x32xf32>
    %cst_23 = arith.constant dense<0.000000e+00> : vector<1x32xf32>
    %38 = tpu.matmul %36, %37, %cst_23 {dimension_numbers = #tpu.dot_dimension_numbers<[1], [0], [0], [1], [0, 0, 1, 1], [], []>} : vector<1x32xf32>, vector<32x32xf32>, vector<1x32xf32> -> vector<1x32xf32>
    %c0_24 = arith.constant 0 : index
    %c0_25 = arith.constant 0 : index
    %39 = vector.load %arg8[%c0_24, %c0_25] : memref<1x32xf32, #tpu.memory_space<vmem>>, vector<1x32xf32>
    %40 = arith.addf %38, %39 : vector<1x32xf32>
    %cst_26 = arith.constant dense<0.000000e+00> : vector<1x8xf32>
    %41 = vector.multi_reduction <add>, %34, %cst_26 [2] : vector<1x8x32xf32> to vector<1x8xf32>
    %cst_27 = arith.constant 3.125000e-02 : f32
    %42 = vector.broadcast %cst_27 : f32 to vector<1x8xf32>
    %43 = arith.mulf %41, %42 : vector<1x8xf32>
    %c0_28 = arith.constant 0 : index
    %c0_29 = arith.constant 0 : index
    %c0_30 = arith.constant 0 : index
    %44 = vector.load %arg9[%c0_28, %c0_29, %c0_30] : memref<1x1x32xf32, #tpu.memory_space<vmem>>, vector<1x1x32xf32>
    %45 = vector.shape_cast %44 : vector<1x1x32xf32> to vector<1x32xf32>
    %46 = vector.shape_cast %40 : vector<1x32xf32> to vector<1x1x32xf32>
    tpu.vector_store %arg9[%c0_28, %c0_29, %c0_30], %46 {strides = array<i32>} : memref<1x1x32xf32, #tpu.memory_space<vmem>>, vector<1x1x32xf32>,
    %c0_31 = arith.constant 0 : index
    %c0_32 = arith.constant 0 : index
    %c0_33 = arith.constant 0 : index
    %47 = vector.load %arg10[%c0_31, %c0_32, %c0_33] : memref<1x1x8xf32, #tpu.memory_space<vmem>>, vector<1x1x8xf32>
    %48 = vector.shape_cast %47 : vector<1x1x8xf32> to vector<1x8xf32>
    %49 = vector.shape_cast %43 : vector<1x8xf32> to vector<1x1x8xf32>
    tpu.vector_store %arg10[%c0_31, %c0_32, %c0_33], %49 {strides = array<i32>} : memref<1x1x8xf32, #tpu.memory_space<vmem>>, vector<1x1x8xf32>,
    return
  }
  func.func @transform_0(%arg0: i32) -> (i32, i32, i32) {
    %c0_i32 = arith.constant 0 : i32
    %c0_i32_0 = arith.constant 0 : i32
    %c0_i32_1 = arith.constant 0 : i32
    return %arg0, %c0_i32, %c0_i32_0 : i32, i32, i32
  }
  func.func @transform_1(%arg0: i32) -> (i32, i32) {
    %c0_i32 = arith.constant 0 : i32
    %c0_i32_0 = arith.constant 0 : i32
    %c0_i32_1 = arith.constant 0 : i32
    return %c0_i32, %c0_i32_0 : i32, i32
  }
  func.func @transform_2(%arg0: i32) -> (i32, i32) {
    %c0_i32 = arith.constant 0 : i32
    %c0_i32_0 = arith.constant 0 : i32
    %c0_i32_1 = arith.constant 0 : i32
    return %c0_i32, %c0_i32_0 : i32, i32
  }
  func.func @transform_3(%arg0: i32) -> (i32, i32) {
    %c0_i32 = arith.constant 0 : i32
    %c0_i32_0 = arith.constant 0 : i32
    %c0_i32_1 = arith.constant 0 : i32
    return %c0_i32, %c0_i32_0 : i32, i32
  }
  func.func @transform_4(%arg0: i32) -> (i32, i32) {
    %c0_i32 = arith.constant 0 : i32
    %c0_i32_0 = arith.constant 0 : i32
    %c0_i32_1 = arith.constant 0 : i32
    return %c0_i32, %c0_i32_0 : i32, i32
  }
  func.func @transform_5(%arg0: i32) -> (i32, i32) {
    %c0_i32 = arith.constant 0 : i32
    %c0_i32_0 = arith.constant 0 : i32
    %c0_i32_1 = arith.constant 0 : i32
    return %c0_i32, %c0_i32_0 : i32, i32
  }
  func.func @transform_6(%arg0: i32) -> (i32, i32) {
    %c0_i32 = arith.constant 0 : i32
    %c0_i32_0 = arith.constant 0 : i32
    %c0_i32_1 = arith.constant 0 : i32
    return %c0_i32, %c0_i32_0 : i32, i32
  }
  func.func @transform_7(%arg0: i32) -> (i32, i32) {
    %c0_i32 = arith.constant 0 : i32
    %c0_i32_0 = arith.constant 0 : i32
    %c0_i32_1 = arith.constant 0 : i32
    return %c0_i32, %c0_i32_0 : i32, i32
  }
  func.func @transform_8(%arg0: i32) -> (i32, i32, i32) {
    %c0_i32 = arith.constant 0 : i32
    %c0_i32_0 = arith.constant 0 : i32
    %c0_i32_1 = arith.constant 0 : i32
    return %arg0, %c0_i32, %c0_i32_0 : i32, i32, i32
  }
  func.func @transform_9(%arg0: i32) -> (i32, i32, i32) {
    %c0_i32 = arith.constant 0 : i32
    %c0_i32_0 = arith.constant 0 : i32
    %c0_i32_1 = arith.constant 0 : i32
    return %arg0, %c0_i32, %c0_i32_0 : i32, i32, i32
  }
}

</mosaic_0001>

<bundles_post_ra>
// kernel: tpu_custom_call.1
= control target key start
LH: loop header
LB: loop body
LE: loop exit
PB: predicated region body
PF: predicated region fallthrough
CT: control target
= control target key end

     0   :  { %s2034_s0 = inlined_call_operand.hbm [shape: f32[2,8,32], index: 0, kind: input, shape index: {}]   ;;  %s2035_s1 = inlined_call_operand.hbm [shape: f32[32,32], index: 1, kind: input, shape index: {}]   ;;  %s2036_s2 = inlined_call_operand.hbm [shape: f32[32,32], index: 2, kind: input, shape index: {}]   ;;  %s2037_s3 = inlined_call_operand.hbm [shape: f32[32,32], index: 3, kind: input, shape index: {}]   ;;  %s2038_s4 = inlined_call_operand.hbm [shape: f32[32,32], index: 4, kind: input, shape index: {}]   ;;  %s2039_s5 = inlined_call_operand.hbm [shape: f32[32,32], index: 5, kind: input, shape index: {}]   ;;  %s2040_s6 = inlined_call_operand.vmem [shape: f32[3,32], index: 6, kind: input, shape index: {}]   ;;  %s2041_s7 = inlined_call_operand.vmem [shape: f32[1,32], index: 7, kind: input, shape index: {}]   ;;  %s2042_s8 = inlined_call_operand.hbm [shape: f32[2,1,32], index: 8, kind: output, shape index: {0}]   ;;  %s2043_s9 = inlined_call_operand.hbm [shape: f32[2,1,8], index: 9, kind: output, shape index: {1}]  }
   0x1   :  { %2048 = sst [smem:[#allocation22_spill]] %s2035_s1 }
   0x2   :  { %2049 = sst [smem:[#allocation23_spill]] %s2042_s8 }
   0x3   :  { %15 = vsyncpa [#allocation3], 0 }
   0x4   :  { %17 = vsyncpa [#allocation3 + $0x1], 0 }
   0x5   :  { %18 = vsyncpa [#allocation6], 0 }
   0x6   :  { %19 = vsyncpa [#allocation9], 0 }
   0x7   :  { %20 = vsyncpa [#allocation12], 0 }
   0x8   :  { %21 = vsyncpa [#allocation4], 0 }
   0x9   :  { %23 = vsyncpa [#allocation4 + $0x1], 0 }
   0xa   :  { %24 = vsyncpa [#allocation15], 0 }
   0xb   :  { %26 = vsyncpa [#allocation15 + $0x1], 0  ;;  %s1647_s30 = smov 0   ;;  %s1649_s10 = smov 0  }
   0xc   :  { %s1651_s11 = smov 0   ;;  %s1653_s12 = smov 0  }
   0xd LB: > { %s1584_s13 = smov [#allocation5]   ;;  %s1668_s15 = sadd.s32 4294967295, %s1582_s12   ;;  %s1582_s12 = sphi %s1653_s12, %s2073_s12   ;;  %s1578_s11 = sphi %s1651_s11, %s2072_s11   ;;  %s1574_s10 = sphi %s1649_s10, %s2071_s10   ;;  %s1570_s30 = sphi %s1647_s30, %s2070_s30  }
   0xe   : > { %s274_s14 = sshll.u32 %s1584_s13, 4  ;;  %p1054_p0 = scmp.ge.s32.totalorder %s1582_s12, 1  ;;  %s1673_s14 = int_to_ptr.vmem [resolvable:$true] %s274_s14 }
   0xf   : > { %p2045_p1 = scmp.eq.s32.totalorder %s1668_s15, 0  ;;  %p262_p2 = scmp.lt.s32.totalorder %s1582_s12, 3 }
  0x10   : > { %s1585_s17 = smov [#allocation8]   ;;  %s1586_s20 = smov [#allocation7]  }
  0x11   : > { %p1675_p3 = pnand %p1054_p0, %p262_p2  ;;  %s300_s18 = sshll.u32 %s1585_s17, 4  ;;  %s1688_s18 = int_to_ptr.vmem [resolvable:$true] %s300_s18 }
  0x12   : > { %s287_s21 = sshll.u32 %s1586_s20, 4  ;;  %s2052_s1 = sld [smem:[#allocation22_spill]]  ;;  %s1690_s21 = int_to_ptr.vmem [resolvable:$true] %s287_s21 }
  0x13   : > { %s2050_s16 = scalar_select %p1675_p3, 1, 0 }
  0x14   : > { %p1217_p5 = pneg %p1675_p3 }
  0x16   : > { %p1684_p6 = pnand %p1217_p5, %p2045_p1 }
  0x18   : > { %s1302_s24 = scalar_lea.hbm %s2052_s1, 512  ;;  %p1700_p8 = pneg %p1684_p6 }
  0x19   : > { %p1303_p7 = scmp.ne.s32.totalorder %s2052_s1, %s1302_s24  ;;  %p1309_p11 = scmp.lt.u32.totalorder %s1302_s24, %s2052_s1 }
  0x1b   : > { %p1305_p9 = pnand %p1700_p8, %p1303_p7 }
  0x1d   : > { %p1306_p10 = pneg %p1305_p9 }
  0x1f   : > { %p1311_p12 = pnand %p1309_p11, %p1306_p10 }
  0x21   : > { %1314 = shalt.err (!%p1311_p12)
}
  0x22   : > { %s1315_s13 = scalar_lea.vmem %s1673_s14, 512  ;;  %p1323_p5 = scmp.lt.s32.totalorder %s1673_s14, %s1673_s14 }
  0x23   : > { %p1316_p13 = scmp.ne.s32.totalorder %s1673_s14, %s1315_s13  ;;  %p1324_p4 = scmp.lt.s32.totalorder %s1315_s13, %s1315_s13 }
  0x25   : > { %p1318_p0 = pnand %p1316_p13, %p1700_p8  ;;  %p1325_p7 = por %p1324_p4, %p1323_p5 }
  0x27   : > { %p1319_p2 = pneg %p1318_p0 }
  0x29   : > { %p1326_p9 = pnand %p1325_p7, %p1319_p2 }
  0x2b   : > { %1329 = shalt.err (!%p1326_p9)
}
  0x2c   : > { %s1587_s17 = smov 128   ;;  %s1588_s20 = smov 8  }
  0x2d   : > { %1220 = dma.hbm_to_vmem [thread:$0]  (!%p1684_p6), %s2052_s1, 512, %s1673_s14, [#allocation6], %s1587_s17, %s1587_s17, %s1588_s20  }
  0x2e   : > { %s1330_s26 = scalar_lea.hbm %s2037_s3, 512 }
  0x2f   : > { %p1331_p4 = scmp.ne.s32.totalorder %s2037_s3, %s1330_s26  ;;  %p1337_p12 = scmp.lt.u32.totalorder %s1330_s26, %s2037_s3 }
  0x31   : > { %p1333_p10 = pnand %p1331_p4, %p1700_p8 }
  0x33   : > { %p1334_p11 = pneg %p1333_p10 }
  0x35   : > { %p1339_p13 = pnand %p1337_p12, %p1334_p11 }
  0x37   : > { %1342 = shalt.err (!%p1339_p13)
}
  0x38   : > { %s1343_s14 = scalar_lea.vmem %s1688_s18, 512  ;;  %p1351_p7 = scmp.lt.s32.totalorder %s1688_s18, %s1688_s18 }
  0x39   : > { %p1344_p0 = scmp.ne.s32.totalorder %s1688_s18, %s1343_s14  ;;  %p1352_p9 = scmp.lt.s32.totalorder %s1343_s14, %s1343_s14 }
  0x3b   : > { %p1346_p2 = pnand %p1344_p0, %p1700_p8  ;;  %p1353_p4 = por %p1352_p9, %p1351_p7 }
  0x3d   : > { %p1347_p5 = pneg %p1346_p2 }
  0x3f   : > { %p1354_p10 = pnand %p1353_p4, %p1347_p5 }
  0x41   : > { %1357 = shalt.err (!%p1354_p10)
}
  0x42   : > { %1226 = dma.hbm_to_vmem [thread:$0]  (!%p1684_p6), %s2037_s3, 512, %s1688_s18, [#allocation9], %s1587_s17, %s1587_s17, %s1588_s20  }
  0x43   : > { %s1358_s25 = scalar_lea.hbm %s2036_s2, 512 }
  0x44   : > { %p1359_p11 = scmp.ne.s32.totalorder %s2036_s2, %s1358_s25  ;;  %p1365_p0 = scmp.lt.u32.totalorder %s1358_s25, %s2036_s2 }
  0x46   : > { %p1361_p12 = pnand %p1359_p11, %p1700_p8 }
  0x48   : > { %p1362_p13 = pneg %p1361_p12 }
  0x4a   : > { %p1367_p2 = pnand %p1365_p0, %p1362_p13 }
  0x4c   : > { %1370 = shalt.err (!%p1367_p2)
}
  0x4d   : > { %s1371_s18 = scalar_lea.vmem %s1690_s21, 512  ;;  %p1379_p4 = scmp.lt.s32.totalorder %s1690_s21, %s1690_s21 }
  0x4e   : > { %p1372_p5 = scmp.ne.s32.totalorder %s1690_s21, %s1371_s18  ;;  %p1380_p10 = scmp.lt.s32.totalorder %s1371_s18, %s1371_s18 }
  0x50   : > { %p1374_p7 = pnand %p1372_p5, %p1700_p8  ;;  %p1381_p11 = por %p1380_p10, %p1379_p4 }
  0x52   : > { %p1375_p9 = pneg %p1374_p7 }
  0x54   : > { %p1382_p12 = pnand %p1381_p11, %p1375_p9 }
  0x56   : > { %1385 = shalt.err (!%p1382_p12)
}
  0x57   : > { %1223 = dma.hbm_to_vmem [thread:$0]  (!%p1684_p6), %s2036_s2, 512, %s1690_s21, [#allocation6], %s1587_s17, %s1587_s17, %s1588_s20  }
  0x58   : > { %s1589_s22 = smov [#allocation10]   ;;  %s1590_s24 = smov [#allocation11]  }
  0x59   : > { %s313_s23 = sshll.u32 %s1589_s22, 4  ;;  %s326_s25 = sshll.u32 %s1590_s24, 4  ;;  %s314_s23 = int_to_ptr.vmem [resolvable:$true] %s313_s23  ;;  %s327_s25 = int_to_ptr.vmem [resolvable:$true] %s326_s25 }
  0x5a   : > { %s1386_s29 = scalar_lea.hbm %s2038_s4, 512 }
  0x5b   : > { %p1387_p13 = scmp.ne.s32.totalorder %s2038_s4, %s1386_s29  ;;  %p1393_p5 = scmp.lt.u32.totalorder %s1386_s29, %s2038_s4 }
  0x5d   : > { %p1389_p0 = pnand %p1387_p13, %p1700_p8 }
  0x5f   : > { %p1390_p2 = pneg %p1389_p0 }
  0x61   : > { %p1395_p7 = pnand %p1393_p5, %p1390_p2 }
  0x63   : > { %1398 = shalt.err (!%p1395_p7)
}
  0x64   : > { %s1399_s21 = scalar_lea.vmem %s314_s23, 512  ;;  %p1407_p11 = scmp.lt.s32.totalorder %s314_s23, %s314_s23 }
  0x65   : > { %p1400_p9 = scmp.ne.s32.totalorder %s314_s23, %s1399_s21  ;;  %p1408_p12 = scmp.lt.s32.totalorder %s1399_s21, %s1399_s21 }
  0x67   : > { %p1402_p4 = pnand %p1400_p9, %p1700_p8  ;;  %p1409_p1 = por %p1408_p12, %p1407_p11 }
  0x69   : > { %p1403_p10 = pneg %p1402_p4 }
  0x6b   : > { %p1410_p3 = pnand %p1409_p1, %p1403_p10 }
  0x6d   : > { %1413 = shalt.err (!%p1410_p3)
}
  0x6e   : > { %1229 = dma.hbm_to_vmem [thread:$0]  (!%p1684_p6), %s2038_s4, 512, %s314_s23, [#allocation9], %s1587_s17, %s1587_s17, %s1588_s20  }
  0x6f   : > { %s1414_s26 = scalar_lea.hbm %s2039_s5, 512 }
  0x70   : > { %p1415_p1 = scmp.ne.s32.totalorder %s2039_s5, %s1414_s26  ;;  %p1421_p0 = scmp.lt.u32.totalorder %s1414_s26, %s2039_s5 }
  0x72   : > { %p1417_p3 = pnand %p1415_p1, %p1700_p8 }
  0x74   : > { %p1418_p13 = pneg %p1417_p3 }
  0x76   : > { %p1423_p2 = pnand %p1421_p0, %p1418_p13 }
  0x78   : > { %1426 = shalt.err (!%p1423_p2)
}
  0x79   : > { %s1427_s14 = scalar_lea.vmem %s327_s25, 512  ;;  %p1435_p4 = scmp.lt.s32.totalorder %s327_s25, %s327_s25 }
  0x7a   : > { %p1428_p5 = scmp.ne.s32.totalorder %s327_s25, %s1427_s14  ;;  %p1436_p10 = scmp.lt.s32.totalorder %s1427_s14, %s1427_s14 }
  0x7c   : > { %p1430_p7 = pnand %p1428_p5, %p1700_p8  ;;  %p1437_p11 = por %p1436_p10, %p1435_p4 }
  0x7e   : > { %p1431_p9 = pneg %p1430_p7 }
  0x80   : > { %p1438_p12 = pnand %p1437_p11, %p1431_p9 }
  0x82   : > { %1441 = shalt.err (!%p1438_p12)
}
  0x83   : > { %1232 = dma.hbm_to_vmem [thread:$0]  (!%p1684_p6), %s2039_s5, 512, %s327_s25, [#allocation12], %s1587_s17, %s1587_s17, %s1588_s20  }
  0x84   : > { %s1053_s19 = sadd.s32 4294967294, %s1582_s12   ;;  %s1820_s27 = sadd.s32 1, %s1582_s12  }
  0x85   : > { %s39_s1 = sadd.s32 1, %s1578_s11  ;;  %s36_s8 = ssub.s32 %s1582_s12, %s1820_s27 }
  0x86   : > { %p46_p8 = scmp.ne.s32.totalorder %s1578_s11, %s1574_s10  ;;  %p37_p1 = scmp.eq.s32.totalorder %s36_s8, 0 }
  0x87   : > { %p47_p3 = scmp.eq.s32.totalorder %s1582_s12, 0  ;;  %p52_p13 = scmp.ne.s32.totalorder %s1574_s10, %s1570_s30 }
  0x88   : > { %p223_p0 = scmp.eq.s32.totalorder %s1668_s15, 1  ;;  %p2054_p5 = scmp.eq.s32.totalorder %s1668_s15, 0 }
  0x89   : > { %s1832_s22 = scalar_select %p37_p1, %s1578_s11, %s39_s1  }
  0x8a   : > { %p48_p2 = por %p47_p3, %p46_p8  ;;  %p1836_p7 = por %p2054_p5, %p52_p13 }
  0x8b   : > { %p1840_p6 = por %p223_p0, %p46_p8  ;;  %p229_p9 = scmp.eq.s32.totalorder %s1053_s19, 1 }
  0x8c   : > { %p1249_p4 = scmp.lt.s32.totalorder %s1582_s12, 2  ;;  %s346_s20 = sand.u32 1, %s1578_s11  }
  0x8d   : > { %s2056_s17 = scalar_select %p1840_p6, 1, 0 }
  0x8e   : > { %p1846_p10 = por %p229_p9, %p52_p13  ;;  %s1061_s26 = sshll.u32 %s346_s20, 3 }
  0x8f   : > { %s1062_s28 = sshll.u32 %s1582_s12, 7  ;;  %s350_s14 = scalar_lea.vmem [#allocation2], %s1061_s26 }
  0x90   : > { %s2057_s25 = scalar_select %p1846_p10, 1, 0 }
  0x91   : > { %s1854_s18 = scalar_lea.hbm %s2034_s0, %s1062_s28  ;;  %s357_s23 = sshll.u32 %s350_s14, 4  ;;  %s1860_s23 = int_to_ptr.vmem [resolvable:$true] %s357_s23 }
  0x92   : > { %p1856_p11 = pnand %p1249_p4, %p48_p2  ;;  %s347_s19 = scalar_lea.sflag [#allocation3], %s346_s20 }
  0x93   : > { %s1442_s1 = scalar_lea.hbm %s1854_s18, 128  ;;  %s1447_s28 = scalar_lea.hbm %s2034_s0, 256 }
  0x94   : > { %p1443_p12 = scmp.ne.s32.totalorder %s1854_s18, %s1442_s1  ;;  %p1444_p8 = pneg %p1856_p11 }
  0x95   : > { %p1448_p13 = scmp.lt.u32.totalorder %s1854_s18, %s2034_s0  ;;  %p1449_p0 = scmp.lt.u32.totalorder %s1447_s28, %s1442_s1 }
  0x96   : > { %p1445_p1 = pnand %p1444_p8, %p1443_p12  ;;  %p1451_p5 = scmp.lt.u32.totalorder %s1442_s1, %s1854_s18 }
  0x97   : > { %p1450_p2 = por %p1449_p0, %p1448_p13 }
  0x98   : > { %p1446_p3 = pneg %p1445_p1 }
  0x99   : > { %p1452_p9 = por %p1451_p5, %p1450_p2 }
  0x9b   : > { %p1453_p4 = pnand %p1452_p9, %p1446_p3 }
  0x9d   : > { %1456 = shalt.err (!%p1453_p4)
}
  0x9e   : > { %s1457_s20 = scalar_lea.vmem %s1860_s23, 128  ;;  %s1591_s14 = smov [#allocation2]  }
  0x9f   : > { %p1458_p12 = scmp.ne.s32.totalorder %s1860_s23, %s1457_s20  ;;  %s1462_s8 = sshll.u32 %s1591_s14, 4  ;;  %s1463_s8 = int_to_ptr.vmem [resolvable:$false] %s1462_s8 }
  0xa0   : > { %s1464_s26 = scalar_lea.vmem %s1463_s8, 256  ;;  %p1465_p6 = scmp.lt.s32.totalorder %s1860_s23, %s1463_s8 }
  0xa1   : > { %p1460_p1 = pnand %p1458_p12, %p1444_p8  ;;  %p1466_p13 = scmp.lt.s32.totalorder %s1464_s26, %s1457_s20 }
  0xa3   : > { %p1461_p10 = pneg %p1460_p1  ;;  %p1467_p0 = por %p1466_p13, %p1465_p6 }
  0xa5   : > { %p1468_p2 = pnand %p1467_p0, %p1461_p10 }
  0xa7   : > { %1471 = shalt.err (!%p1468_p2)
}
  0xa8   : > { %1236 = dma.hbm_to_vmem [thread:$0]  (!%p1856_p11), %s1854_s18, 128, %s1860_s23, %s347_s19  }
  0xa9   : > { %p2059_p3 = scmp.ne.s32.totalorder %s2050_s16, 0 }
  0xaa   : > { %s1890_s1 = sand.u32 (!%p2059_p3), 1, %s1574_s10  }
  0xab   : > { %366 = sbr.rel (%p2059_p3) target bundleno = 933 (0x3a5), region = 52  ;;  %s1064_s28 = sshll.u32 (!%p2059_p3), %s1890_s1, 3 }
  0xac   : > { %s369_s29 = scalar_lea.sflag (!%p2059_p3), [#allocation3], %s1890_s1  ;;  %s372_s13 = scalar_lea.vmem (!%p2059_p3), [#allocation2], %s1064_s28 }
  0xb2   : > { %1545 = dma.done.wait (%p1836_p7), %s369_s29, 128  }
  0xb3   : > { %1547 = vsyncadd (%p1836_p7), %s369_s29, 4294967168  ;;  %p2060_p6 = scmp.eq.s32.totalorder %s1668_s15, 0 }
  0xb5   : > { %1549 = dma.done.wait (%p2060_p6), [#allocation6], 1024   ;;  %p2061_p10 = pmov %p2060_p6 }
  0xb6   : > { %p2062_p11 = pmov %p2060_p6 }
  0xb7   : > { %1551 = vsyncadd (%p2061_p10), [#allocation6], 4294966272 }
  0xb8   : > { %1553 = dma.done.wait (%p2062_p11), [#allocation9], 1024   ;;  %p2063_p8 = pmov %p2060_p6 }
  0xb9   : > { %p2064_p5 = pmov %p2060_p6 }
  0xba   : > { %1555 = vsyncadd (%p2063_p8), [#allocation9], 4294966272 }
  0xbb   : > { %1557 = dma.done.wait (%p2064_p5), [#allocation12], 512   ;;  %p2065_p9 = pmov %p2064_p5 }
  0xbc   : > { %v1592_v0 = vmov 0.0|0.0   ;;  %vm1593_vm0 = vmmov 0   ;;  %v1594_v1 = vmov 0.0   ;;  %v439_v2 = vld [vmem:[#allocation5] sm:$0xff]  ;;  %v440_v3 = vld [vmem:[#allocation5 + $0x8] sm:$0xff]  ;;  %vm431_vm1 = vcmask 261120  }
  0xbd   : > { %1559 = vsyncadd (%p2065_p9), [#allocation12], 4294966784  ;;  %1161 = vmatprep.subr.bf16.mxu0 %v1592_v0  ;;  %1167 = vmatprep.subr.bf16.mxu1 %v1592_v0  ;;  %v517_v4 = vld [vmem:[#allocation7] sm:$0xff]  ;;  %v1162_v5 = vpack.c.bf16 %v440_v3, %v439_v2  ;;  %v518_v6 = vld [vmem:[#allocation7 + $0x8] sm:$0xff]  ;;  %v678_v34 = vlaneseq  ;;  %s1077_s20 = sshll.u32 %s1668_s15, 4  ;;  %s429_s14 = scalar_lea.vmem [#allocation14], %s1890_s1 }
  0xbe   : > { %1114 = vmatprep.mubr.msk.f32.mxu0 %vm1593_vm0, %v1594_v1  ;;  %1125 = vmatprep.mubr.msk.f32.mxu1 %vm1593_vm0, %v1594_v1  ;;  %v441_v7 = vld [vmem:[#allocation5 + $0x10] sm:$0xff]  ;;  %v442_v8 = vld [vmem:[#allocation5 + $0x18] sm:$0xff]  ;;  %v1168_v9 = vpack.c.bf16 %v518_v6, %v517_v4  ;;  %v683_v22 = vld [vmem:[#allocation11] sm:$0xff]  ;;  %s911_s8 = sshll.u32 %s429_s14, 4  ;;  %vm879_vm2 = vcmask 57344   ;;  %s1955_s29 = scalar_lea.hbm %s2043_s9, %s1077_s20  ;;  %s1957_s8 = int_to_ptr.vmem [resolvable:$true] %s911_s8 }
  0xbf   : > { %v519_v10 = vld [vmem:[#allocation7 + $0x10] sm:$0xff]  ;;  %v520_v11 = vld [vmem:[#allocation7 + $0x18] sm:$0xff]  ;;  %1163 = vmatpush3.bf16.msra.mxu0 %v1162_v5  ;;  %v1165_v13 = vpack.c.bf16 %v442_v8, %v441_v7  ;;  %v684_v23 = vld [vmem:[#allocation11 + $0x8] sm:$0xff]  ;;  %v1928_v35 = vshrl.u32 %v678_v34, 7  ;;  %s1472_s16 = scalar_lea.vmem %s1957_s8, 16  ;;  %p2066_p4 = scmp.ne.s32.totalorder %s2056_s17, 0 }
  0xc0   : > { %v430_v12 = vld [vmem:[%s372_s13] sm:$0xff]  ;;  %1169 = vmatpush3.bf16.msra.mxu1 %v1168_v9  ;;  %1164 = vmatprep.subr.bf16.mxu0 %v1592_v0  ;;  %v1171_v15 = vpack.c.bf16 %v520_v11, %v519_v10  ;;  %v1180_v24 = vpack.c.bf16 %v684_v23, %v683_v22  ;;  %v599_v28 = vld [vmem:[#allocation8] sm:$0xff]  ;;  %v600_v29 = vld [vmem:[#allocation8 + $0x8] sm:$0xff]  ;;  %v873_v23 = vand.u32 127, %v678_v34  ;;  %s886_s13 = scalar_lea.sflag [#allocation15], %s1890_s1  ;;  %p1473_p7 = scmp.ne.s32.totalorder %s1957_s8, %s1472_s16 }
  0xc1   : > { %v432_v14 = vsel %vm431_vm1, %v430_v12, -inf  ;;  %1170 = vmatprep.subr.bf16.mxu1 %v1592_v0  ;;  %v685_v25 = vld [vmem:[#allocation11 + $0x10] sm:$0xff]  ;;  %v686_v26 = vld [vmem:[#allocation11 + $0x18] sm:$0xff]  ;;  %v1174_v31 = vpack.c.bf16 %v600_v29, %v599_v28  ;;  %v680_v40 = vsub.s32 0, %v1928_v35  ;;  %v787_v49 = vld [vmem:[#allocation10] sm:$0xff]  ;;  %s1595_s24 = smov [#allocation14]  }
  0xc2   : > { %v433_v16 = vrot.slane %v432_v14, 4  ;;  %v1183_v27 = vpack.c.bf16 %v686_v26, %v685_v25  ;;  %v601_v30 = vld [vmem:[#allocation8 + $0x10] sm:$0xff]  ;;  %v602_v32 = vld [vmem:[#allocation8 + $0x18] sm:$0xff]  ;;  %v788_v50 = vld [vmem:[#allocation10 + $0x8] sm:$0xff]  ;;  %p1474_p12 = pnand %p1473_p7, %p2066_p4  ;;  %s1476_s18 = sshll.u32 %s1595_s24, 4  ;;  %s1477_s18 = int_to_ptr.vmem [resolvable:$false] %s1476_s18 }
  0xc3   : > { %1166 = vmatpush3.bf16.msra.mxu0 %v1165_v13  ;;  %v1177_v33 = vpack.c.bf16 %v602_v32, %v601_v30  ;;  %v443_v38 = vld [vmem:[%s2040_s6] sm:$0x1]  ;;  %v1071_v39 = vld [vmem:[%s2040_s6 + $0x1] ss:$0 sm:$0xff]  ;;  %v1186_v51 = vpack.c.bf16 %v788_v50, %v787_v49  ;;  %v790_v53 = vld [vmem:[#allocation10 + $0x18] sm:$0xff]  ;;  %s1478_s23 = scalar_lea.vmem %s1477_s18, 32  ;;  %p1479_p13 = scmp.lt.s32.totalorder %s1957_s8, %s1477_s18 }
  0xc4   : > { %v434_v17 = vmax.f32 %v432_v14, %v433_v16  ;;  %1172 = vmatpush3.bf16.msra.mxu1 %v1171_v15  ;;  %1173 = vmatprep.subr.bf16.mxu0 %v1592_v0  ;;  %v789_v52 = vld [vmem:[#allocation10 + $0x10] sm:$0xff]  ;;  %p1475_p1 = pneg %p1474_p12  ;;  %p1480_p0 = scmp.lt.s32.totalorder %s1478_s23, %s1472_s16 }
  0xc5   : > { %1179 = vmatprep.subr.bf16.mxu1 %v1592_v0  ;;  %v1189_v54 = vpack.c.bf16 %v790_v53, %v789_v52  ;;  %v1073_v10 = vld [vmem:[%s2040_s6 + $0x2] ss:$0 sm:$0xff] }
  0xc6   : > { %v435_v18 = vrot.slane %v434_v17, 2  ;;  %p1481_p2 = por %p1480_p0, %p1479_p13 }
  0xc7   : > { %1126 = vmatmul.mubr.msk.f32.vlgmr.msra.gmra.mrb[0].mxu1 %vm431_vm1, %v430_v12 }
  0xc8   : > { %v436_v19 = vmax.f32 %v434_v17, %v435_v18  ;;  %1147 = vmatprep.mubr.msk.f32.mxu1 %vm1593_vm0, %v1594_v1  ;;  %1181 = vmatpush3.bf16.msra.mxu1 %v1180_v24  ;;  %v876_v24 = vsub.s32 %v873_v23, %v1928_v35  ;;  %p1482_p3 = pnand %p1481_p2, %p1475_p1 }
  0xc9   : > { %1182 = vmatprep.subr.bf16.mxu1 %v1592_v0 }
  0xca   : > { %v437_v20 = vrot.slane %v436_v19, 1 }
  0xcc   : > { %v438_v21 = vmax.f32 %v436_v19, %v437_v20  ;;  %1184 = vmatpush3.bf16.msra.mxu1 %v1183_v27 }
  0xce   : > { %1115 = vmatmul.mubr.msk.f32.vlgmr.msra.gmra.mrb[0].mxu0 %vm431_vm1, %v438_v21 }
  0xcf   : > { %1136 = vmatprep.mubr.msk.f32.mxu0 %vm1593_vm0, %v1594_v1  ;;  %1175 = vmatpush3.bf16.msra.mxu0 %v1174_v31 }
  0xd0   : > { %1176 = vmatprep.subr.bf16.mxu0 %v1592_v0 }
  0xd3   : > { %1178 = vmatpush3.bf16.msra.mxu0 %v1177_v33 }
  0xd4   : > { %1185 = vmatprep.subr.bf16.mxu0 %v1592_v0 }
  0xd6   : > { %1137 = vmatmul.mubr.msk.f32.vlgmr.msra.gmra.mrb[2].mxu0 %vm431_vm1, %v430_v12 }
  0xd7   : > { %1158 = vmatprep.mubr.msk.f32.mxu0 %vm1593_vm0, %v1594_v1  ;;  %1187 = vmatpush3.bf16.msra.mxu0 %v1186_v51 }
  0xd8   : > { %1188 = vmatprep.subr.bf16.mxu0 %v1592_v0 }
  0xdb   : > { %1190 = vmatpush3.bf16.msra.mxu0 %v1189_v54 }
 0x19a   : > { %v595_v36 = vpop.f32.mrb[0].mxu1 }
 0x19b   : > { %v1127_v37 = vpop.f32.mrb[1].mxu1  ;;  %v596_v44 = vadd.f32 %v1071_v39, %v595_v36 }
 0x1a1   : > { %v513_v41 = vpop.f32.mrb[0].mxu0 }
 0x1a2   : > { %v514_v42 = vadd.f32 %v513_v41, %v443_v38  ;;  %v1116_v43 = vpop.f32.mrb[1].mxu0 }
 0x1a4   : > { %v681_v45 = vrot.slane %v514_v42, %v680_v40 }
 0x1a6   : > { %v682_v46 = vmul.f32 %v681_v45, %v596_v44 }
 0x1a8   : > { %1148 = vmatmul.mubr.msk.f32.vlgmr.msra.gmra.mrb[2].mxu1 %vm431_vm1, %v682_v46 }
 0x1a9   : > { %v674_v47 = vpop.f32.mrb[2].mxu0 }
 0x1aa   : > { %v1138_v48 = vpop.f32.mrb[3].mxu0  ;;  %v675_v11 = vadd.f32 %v1073_v10, %v674_v47 }
 0x27b   : > { %v756_v55 = vpop.f32.mrb[2].mxu1 }
 0x27c   : > { %v760_v56 = vsel %vm431_vm1, %v756_v55, -inf  ;;  %v1149_v57 = vpop.f32.mrb[3].mxu1 }
 0x27d   : > { %v761_v58 = vrot.slane %v760_v56, 4 }
 0x27f   : > { %v762_v59 = vmax.f32 %v760_v56, %v761_v58 }
 0x281   : > { %v763_v60 = vrot.slane %v762_v59, 2 }
 0x283   : > { %v764_v61 = vmax.f32 %v762_v59, %v763_v60 }
 0x285   : > { %v765_v62 = vrot.slane %v764_v61, 1 }
 0x287   : > { %v766_v63 = vmax.f32 %v764_v61, %v765_v62 }
 0x289   : > { %v767_v1 = vsub.f32 %v756_v55, %v766_v63 }
 0x28b   : > { %v768_v2 = vmul.f32 1.442695, %v767_v1 }
 0x28d   : > { %1298 = vpow2.f32 %v768_v2 }
 0x297   : > { %v1299_v3 = vpop.eup %1298 }
 0x298   : > { %v770_v0 = vsel %vm431_vm1, %v1299_v3, 0.0 }
 0x299   : > { %v771_v4 = vrot.slane %v770_v0, 4 }
 0x29b   : > { %v772_v5 = vadd.f32 %v771_v4, %v770_v0 }
 0x29d   : > { %v773_v6 = vrot.slane %v772_v5, 2 }
 0x29f   : > { %v774_v7 = vadd.f32 %v773_v6, %v772_v5 }
 0x2a1   : > { %v775_v8 = vrot.slane %v774_v7, 1 }
 0x2a3   : > { %v776_v9 = vadd.f32 %v775_v8, %v774_v7 }
 0x2a5   : > { %1300 = vrcp.f32 %v776_v9 }
 0x2af   : > { %v1301_v12 = vpop.eup %1300 }
 0x2b0   : > { %v778_v13 = vmul.f32 %v1301_v12, %v1299_v3 }
 0x2b2   : > { %v779_v14 = vmul.f32 %v778_v13, %v675_v11  ;;  %v865_v15 = vsel %vm431_vm1, %v778_v13, 0.0 }
 0x2b3   : > { %866 = vadd.xlane.f32.xlu0 %v865_v15 }
 0x2b4   : > { %v780_v16 = vsel %vm431_vm1, %v779_v14, 0.0 }
 0x2b5   : > { %v781_v17 = vrot.slane %v780_v16, 4 }
 0x2b7   : > { %v782_v18 = vadd.f32 %v781_v17, %v780_v16 }
 0x2b9   : > { %v783_v19 = vrot.slane %v782_v18, 2 }
 0x2bb   : > { %v784_v20 = vadd.f32 %v783_v19, %v782_v18 }
 0x2bd   : > { %v785_v21 = vrot.slane %v784_v20, 1 }
 0x2bf   : > { %v786_v22 = vadd.f32 %v785_v21, %v784_v20 }
 0x2c1   : > { %1159 = vmatmul.mubr.msk.f32.vlgmr.msra.gmra.mrb[4].mxu0 %vm431_vm1, %v786_v22 }
 0x340   : > { %v867_v25 = vpop.xlane.xlu0 %866 }
 0x341   : > { %v868_v26 = vmul.f32 0.03125, %v867_v25 }
 0x343   : > { %v877_v27 = vrot.slane %v868_v26, %v876_v24 }
 0x345   : > { %880 = vst.msk [vmem:[%s429_s14] sm:$0x1] %vm879_vm2, %v877_v27 }
 0x346   : > { %1485 = shalt.err (!%p1482_p3)
}
 0x347   : > { %s1486_s21 = scalar_lea.hbm %s1955_s29, 16  ;;  %s1490_s26 = scalar_lea.hbm %s2043_s9, 32 }
 0x348   : > { %p1487_p6 = scmp.ne.s32.totalorder %s1955_s29, %s1486_s21  ;;  %p1491_p8 = scmp.lt.u32.totalorder %s1955_s29, %s2043_s9 }
 0x349   : > { %p1492_p5 = scmp.lt.u32.totalorder %s1490_s26, %s1486_s21  ;;  %p1494_p7 = scmp.lt.u32.totalorder %s1486_s21, %s1955_s29 }
 0x34a   : > { %p1488_p10 = pnand %p1487_p6, %p2066_p4 }
 0x34b   : > { %p1493_p9 = por %p1492_p5, %p1491_p8 }
 0x34c   : > { %p1489_p11 = pneg %p1488_p10 }
 0x34d   : > { %p1495_p12 = por %p1494_p7, %p1493_p9 }
 0x34f   : > { %p1496_p1 = pnand %p1495_p12, %p1489_p11 }
 0x351   : > { %1499 = shalt.err (!%p1496_p1)
}
 0x352   : > { %1214 = dma.vmem_to_hbm [thread:$0]  (%p2066_p4), %s1957_s8, 16, %s1955_s29, %s886_s13   ;;  %v791_v28 = vld [vmem:[%s2041_s7] sm:$0x1]  ;;  %vm869_vm3 = vcmask 253952  }
 0x353   : > { %s423_s23 = scalar_lea.vmem [#allocation13], %s1890_s1  ;;  %s2067_s26 = sld [smem:[#allocation23_spill]] }
 0x354   : > { %s898_s19 = sshll.u32 %s423_s23, 4  ;;  %s882_s8 = scalar_lea.sflag [#allocation4], %s1890_s1  ;;  %s1992_s19 = int_to_ptr.vmem [resolvable:$true] %s898_s19 }
 0x355   : > { %s1500_s29 = scalar_lea.vmem %s1992_s19, 16  ;;  %s1596_s13 = smov [#allocation13]  }
 0x356   : > { %p1501_p13 = scmp.ne.s32.totalorder %s1992_s19, %s1500_s29  ;;  %s1504_s24 = sshll.u32 %s1596_s13, 4  ;;  %s1505_s24 = int_to_ptr.vmem [resolvable:$false] %s1504_s24 }
 0x357   : > { %s1506_s15 = scalar_lea.vmem %s1505_s24, 32  ;;  %p1507_p3 = scmp.lt.s32.totalorder %s1992_s19, %s1505_s24 }
 0x358   : > { %p1502_p0 = pnand %p1501_p13, %p2066_p4  ;;  %p1508_p6 = scmp.lt.s32.totalorder %s1506_s15, %s1500_s29 }
 0x359   : > { %s1990_s28 = scalar_lea.hbm %s2067_s26, %s1077_s20 }
 0x35a   : > { %p1503_p2 = pneg %p1502_p0  ;;  %p1509_p10 = por %p1508_p6, %p1507_p3 }
 0x35c   : > { %p1510_p11 = pnand %p1509_p10, %p1503_p2 }
 0x394   : > { %v861_v29 = vpop.f32.mrb[4].mxu0 }
 0x395   : > { %v862_v30 = vadd.f32 %v861_v29, %v791_v28  ;;  %v1160_v31 = vpop.f32.mrb[5].mxu0 }
 0x397   : > { %870 = vst.msk [vmem:[%s423_s23] sm:$0x1] %vm869_vm3, %v862_v30 }
 0x398   : > { %1513 = shalt.err (!%p1510_p11)
}
 0x399   : > { %s1514_s1 = scalar_lea.hbm %s1990_s28, 16  ;;  %s1518_s18 = scalar_lea.hbm %s2067_s26, 32 }
 0x39a   : > { %p1515_p8 = scmp.ne.s32.totalorder %s1990_s28, %s1514_s1  ;;  %p1519_p7 = scmp.lt.u32.totalorder %s1990_s28, %s2067_s26 }
 0x39b   : > { %p1520_p12 = scmp.lt.u32.totalorder %s1518_s18, %s1514_s1  ;;  %p1522_p13 = scmp.lt.u32.totalorder %s1514_s1, %s1990_s28 }
 0x39c   : > { %p1516_p5 = pnand %p1515_p8, %p2066_p4 }
 0x39d   : > { %p1521_p1 = por %p1520_p12, %p1519_p7 }
 0x39e   : > { %p1517_p9 = pneg %p1516_p5 }
 0x39f   : > { %p1523_p0 = por %p1522_p13, %p1521_p1 }
 0x3a1   : > { %p1524_p2 = pnand %p1523_p0, %p1517_p9 }
 0x3a3   : > { %1527 = shalt.err (!%p1524_p2)
}
 0x3a4   : > { %1213 = dma.vmem_to_hbm [thread:$0]  (%p2066_p4), %s1992_s19, 16, %s1990_s28, %s882_s8  }
 0x3a5 PF: > { %s923_s14 = sand.u32 1, %s1570_s30   ;;  %p2068_p3 = scmp.ne.s32.totalorder %s2057_s25, 0 }
 0x3a6   : > { %p2069_p6 = scmp.ge.s32.totalorder %s1582_s12, 2  ;;  %s924_s29 = scalar_lea.sflag [#allocation4], %s923_s14 }
 0x3a8   : > { %p1238_p10 = pnand %p2069_p6, %p2068_p3 }
 0x3aa   : > { %1561 = dma.done.wait (!%p1238_p10), %s924_s29, 16  }
 0x3ab   : > { %1563 = vsyncadd (!%p1238_p10), %s924_s29, 4294967280  ;;  %s932_s13 = scalar_lea.sflag [#allocation15], %s923_s14 }
 0x3ac   : > { %1565 = dma.done.wait (!%p1238_p10), %s932_s13, 16  }
 0x3ad   : > { %1567 = vsyncadd (!%p1238_p10), %s932_s13, 4294967280  ;;  %p29_p4 = scmp.ge.s32.totalorder %s1820_s27, 4   ;;  %s2070_s30 = smov %s1574_s10 }
 0x3ae   : > { %s2071_s10 = smov %s1578_s11  ;;  %s2072_s11 = smov %s1832_s22 }
 0x3af   : > { %s2073_s12 = smov %s1820_s27  ;;  %31 = sbr.rel (!%p29_p4) target bundleno = 13 (0xd), region = 134 }
 0x3b6   :  { %936 = vsyncpa [#allocation3], 1 }
 0x3b7   :  { %938 = vsyncpa [#allocation3 + $0x1], 1 }
 0x3b8   :  { %939 = vsyncpa [#allocation6], 1 }
 0x3b9   :  { %940 = vsyncpa [#allocation9], 1 }
 0x3ba   :  { %941 = vsyncpa [#allocation12], 1 }
 0x3bb   :  { %942 = vsyncpa [#allocation4], 1 }
 0x3bc   :  { %944 = vsyncpa [#allocation4 + $0x1], 1 }
 0x3bd   :  { %945 = vsyncpa [#allocation15], 1 }
 0x3be   :  { %947 = vsyncpa [#allocation15 + $0x1], 1 }

</bundles_post_ra>
